<compile_context>
chip_gen: v7x
topology: tpu7x:2x2x1
jax: 0.10.0
libtpu: 0.0.40
codegen_flags: <defaults>
</compile_context>

<pallas_src>
import functools

import jax
import jax.numpy as jnp
from jax.experimental import pallas as pl
from jax.experimental.pallas import tpu as pltpu


def head_kernel(x_ref, w_ref, b_ref, o_ref, acc_ref, *, hw_pad, inv_hw):
    # x_ref:   (BT*HW_pad, C_tile)  NHWC-flattened backbone features
    # w_ref:   (C_tile, K_pad)      BN-folded 1x1-conv weight (feature dtype)
    # b_ref:   (HW_pad, K_pad)      folded bias, zeroed on padded spatial rows (f32)
    # o_ref:   (BT, K_pad)          pooled logits (f32), lane-dense store
    # acc_ref: (BT*HW_pad, K_pad)   f32 pre-activation accumulator (VMEM scratch)
    c_idx = pl.program_id(1)

    @pl.when(c_idx == 0)
    def _init():
        acc_ref[...] = jnp.zeros_like(acc_ref)

    # One fused MXU matmul per step: lane dim = K_pad (dense), f32 accumulation.
    acc_ref[...] += jnp.dot(x_ref[...], w_ref[...],
                            preferred_element_type=jnp.float32)

    @pl.when(c_idx == pl.num_programs(1) - 1)
    def _finalize():
        m, k_pad = acc_ref.shape
        bt = m // hw_pad
        # Sublane-aligned split (hw_pad % 8 == 0) -> layout-preserving reshape.
        s = acc_ref[...].reshape(bt, hw_pad, k_pad)
        # Masked bias (zero on padded rows) + ReLU; padded rows contribute 0.
        s = jnp.maximum(s + b_ref[...][None, :, :], 0.0)
        # AdaptiveAvgPool2d((1,1)) + flatten: per-image mean over spatial dim.
        o_ref[...] = jnp.sum(s, axis=1) * inv_hw


def my_model_head(x_nchw, conv_w, conv_b, bn_gamma, bn_beta, bn_mean, bn_var,
                  eps=1e-5, max_block_bytes=None):
    """Fused Dropout(0) + 1x1 Conv + BatchNorm(eval) + ReLU + AvgPool + flatten.

    x_nchw: (N, C, H, W) backbone features (float32 or bfloat16, NCHW)
    conv_w: (K, C, 1, 1);  conv_b / bn_*: (K,)   (float32)
    returns: (N, K) float32
    """
    N, C, H, W = x_nchw.shape
    K = conv_w.shape[0]
    HW = H * W
    HW_pad = ((HW + 7) // 8) * 8          # sublane-aligned spatial extent
    K_pad = max(128, ((K + 127) // 128) * 128)   # lane-dense output width
    itemsize = x_nchw.dtype.itemsize

    # ---- generation-gated VMEM budget --------------------------------------
    try:
        vmem_cap = int(getattr(pltpu.get_tpu_info(), "vmem_capacity_bytes",
                               64 << 20))
    except Exception:
        vmem_cap = 64 << 20               # conservative default
    if vmem_cap >= (100 << 20):           # v5e / v6e: 128 MiB VMEM
        default_block, vmem_ceiling = 24 << 20, 96 << 20
    else:                                 # v7x: 64 MiB per TensorCore
        default_block, vmem_ceiling = 5 << 20, 40 << 20
    if max_block_bytes is None:
        max_block_bytes = default_block

    # ---- parameter folding (plain JAX, O(K*C)) -----------------------------
    scale = bn_gamma / jnp.sqrt(bn_var + eps)                       # (K,)
    w_f = conv_w.reshape(K, C).astype(jnp.float32) * scale[:, None] # (K, C)
    b_f = conv_b.astype(jnp.float32) * scale + (bn_beta - bn_mean * scale)

    w_pad = jnp.zeros((C, K_pad), jnp.float32).at[:, :K].set(w_f.T)
    w_pad = w_pad.astype(x_nchw.dtype)                   # bf16-friendly MXU
    b_pad = jnp.zeros((HW_pad, K_pad), jnp.float32)
    b_pad = b_pad.at[:HW, :K].set(jnp.broadcast_to(b_f[None, :], (HW, K)))

    # ---- batch-tile selection (lane/sublane-padded VMEM accounting) --------
    c_lanes = max(128, ((C + 127) // 128) * 128)
    per_image = HW_pad * c_lanes * itemsize
    bt = int(max(1, min(N, max_block_bytes // max(per_image, 1))))
    if N > 8:
        bt = max(8, (bt // 8) * 8)        # keep output block sublane-aligned
    else:
        bt = N                            # single tile == full batch dim
    n_pad = ((N + bt - 1) // bt) * bt
    n_batch_steps = n_pad // bt

    # C-reduction tiling only when the batch grid alone cannot pipeline.
    c_tile = C
    if n_batch_steps < 4 and C >= 512 and C % 128 == 0:
        for cand in (C // 4, C // 2, 256, 128):
            if cand >= 128 and cand % 128 == 0 and C % cand == 0:
                c_tile = cand
                break
    n_c_steps = C // c_tile

    w_itemsize = w_pad.dtype.itemsize

    def _vmem_needed(bt_):
        x_blk = bt_ * HW_pad * max(128, ((c_tile + 127) // 128) * 128) * itemsize
        w_blk = ((c_tile + 7) // 8) * 8 * K_pad * w_itemsize
        b_blk = HW_pad * K_pad * 4
        o_blk = max(bt_, 8) * K_pad * 4
        acc_blk = bt_ * HW_pad * K_pad * 4
        w_bufs = 1 if n_c_steps == 1 else 2
        return 2 * x_blk + w_bufs * w_blk + b_blk + 2 * o_blk + acc_blk

    # Shrink bt until the real (padded, double-buffered) working set fits.
    while bt > 8 and _vmem_needed(bt) + (4 << 20) > vmem_ceiling:
        bt -= 8
    n_pad = ((N + bt - 1) // bt) * bt
    vmem_limit = int(min(max(_vmem_needed(bt) + (4 << 20), 16 << 20),
                         vmem_ceiling))

    # ---- layout plumbing: NCHW -> NHWC-flattened (n_pad*HW_pad, C) ---------
    # TODO(synk): a TPU-native backbone would emit NHWC directly, making this
    # wrapper transpose/pad disappear.
    x = jnp.transpose(x_nchw, (0, 2, 3, 1)).reshape(N, HW, C)
    if HW_pad != HW or n_pad != N:
        x = jnp.pad(x, ((0, n_pad - N), (0, HW_pad - HW), (0, 0)))
    x = x.reshape(n_pad * HW_pad, C)

    # ---- block specs --------------------------------------------------------
    def _resident_spec(shape):
        # Constant-index block: request single-buffering to save VMEM.
        try:
            return pl.BlockSpec(shape, lambda i, c: (0, 0),
                                pipeline_mode=pl.Buffered(1))
        except Exception:
            return pl.BlockSpec(shape, lambda i, c: (0, 0))

    x_spec = pl.BlockSpec((bt * HW_pad, c_tile), lambda i, c: (i, c))
    if n_c_steps == 1:
        w_spec = _resident_spec((c_tile, K_pad))
    else:
        w_spec = pl.BlockSpec((c_tile, K_pad), lambda i, c: (c, 0))
    b_spec = _resident_spec((HW_pad, K_pad))
    o_spec = pl.BlockSpec((bt, K_pad), lambda i, c: (i, 0))

    out = pl.pallas_call(
        functools.partial(head_kernel, hw_pad=HW_pad, inv_hw=1.0 / HW),
        out_shape=jax.ShapeDtypeStruct((n_pad, K_pad), jnp.float32),
        grid_spec=pltpu.PrefetchScalarGridSpec(
            num_scalar_prefetch=0,
            grid=(n_pad // bt, n_c_steps),
            in_specs=[x_spec, w_spec, b_spec],
            out_specs=o_spec,
            scratch_shapes=[pltpu.VMEM((bt * HW_pad, K_pad), jnp.float32)],
        ),
        compiler_params=pltpu.CompilerParams(
            dimension_semantics=("parallel", "arbitrary"),
            vmem_limit_bytes=vmem_limit),
    )(x, w_pad, b_pad)

    return out[:N, :K]


def reference_head(x_nchw, conv_w, conv_b, bn_gamma, bn_beta, bn_mean, bn_var,
                   eps=1e-5):
    # Pure-JAX reference matching PyTorch eval-mode semantics.
    N, C, H, W = x_nchw.shape
    K = conv_w.shape[0]
    x = x_nchw.astype(jnp.float32)
    y = jnp.einsum('nchw,kc->nkhw', x, conv_w.reshape(K, C)) \
        + conv_b[None, :, None, None]
    scale = bn_gamma / jnp.sqrt(bn_var + eps)
    y = y * scale[None, :, None, None] + \
        (bn_beta - bn_mean * scale)[None, :, None, None]
    y = jnp.maximum(y, 0.0)
    return jnp.mean(y, axis=(2, 3))                                 # (N, K)


if __name__ == "__main__":
    key = jax.random.PRNGKey(0)

    def make_inputs(k, N, C, H, W, K):
        kx, kw, kb, kg, kbe, km, kv = jax.random.split(k, 7)
        x = jax.random.normal(kx, (N, C, H, W), dtype=jnp.float32)
        conv_w = jax.random.normal(kw, (K, C, 1, 1), dtype=jnp.float32) * 0.05
        conv_b = jax.random.normal(kb, (K,), dtype=jnp.float32) * 0.1
        bn_gamma = 1.0 + 0.1 * jax.random.normal(kg, (K,), dtype=jnp.float32)
        bn_beta = 0.1 * jax.random.normal(kbe, (K,), dtype=jnp.float32)
        bn_mean = 0.1 * jax.random.normal(km, (K,), dtype=jnp.float32)
        bn_var = jnp.abs(jax.random.normal(kv, (K,), dtype=jnp.float32)) + 0.5
        return (x, conv_w, conv_b, bn_gamma, bn_beta, bn_mean, bn_var)

    # Case 1: small module-consistent shapes (backbone_size=32 -> num_classes=8).
    args = make_inputs(key, 4, 32, 4, 4, 8)
    ref = reference_head(*args)

    out = jax.block_until_ready(my_model_head(*args))
    assert out.shape == (4, 8)
    assert jnp.allclose(out, ref, atol=1e-4, rtol=1e-4), (out, ref)

    # bfloat16 feature path (halves HBM traffic; MXU accumulates in f32).
    out_bf16 = jax.block_until_ready(
        my_model_head(args[0].astype(jnp.bfloat16), *args[1:]))
    assert jnp.allclose(out_bf16, ref, atol=3e-2, rtol=3e-2), (out_bf16, ref)

    # Case 2: multi-tile batch + non-multiple-of-8 spatial (exercises padding).
    args2 = make_inputs(jax.random.fold_in(key, 1), 9, 32, 3, 3, 8)
    ref2 = reference_head(*args2)
    out2 = jax.block_until_ready(my_model_head(*args2))
    assert out2.shape == (9, 8)
    assert jnp.allclose(out2, ref2, atol=1e-4, rtol=1e-4), (out2, ref2)

    print("KERNEL_OK")
</pallas_src>

<mosaic_0001>
module attributes {stable_mosaic.version = 11 : i64} {
  func.func @head_kernel(%arg0: i32, %arg1: i32, %arg2: memref<64x32xf32, #tpu.memory_space<vmem>>, %arg3: memref<32x128xf32, #tpu.memory_space<vmem>>, %arg4: memref<16x128xf32, #tpu.memory_space<vmem>>, %arg5: memref<4x128xf32, #tpu.memory_space<vmem>>, %arg6: memref<64x128xf32, #tpu.memory_space<vmem>>) attributes {dimension_semantics = [#tpu.dimension_semantics<parallel>, #tpu.dimension_semantics<arbitrary>], iteration_bounds = array<i64: 1, 1>, scalar_prefetch = 0 : i64, scratch_operands = 1 : i64, tpu.core_type = #tpu.core_type<tc>, window_params = [{transform_indices = @transform_0, window_bounds = array<i64: 64, 32>}, {pipeline_mode = #tpu.pipeline_mode<synchronous>, transform_indices = @transform_1, window_bounds = array<i64: 32, 128>}, {pipeline_mode = #tpu.pipeline_mode<synchronous>, transform_indices = @transform_2, window_bounds = array<i64: 16, 128>}, {transform_indices = @transform_3, window_bounds = array<i64: 4, 128>}]} {
    %c0_i32 = arith.constant 0 : i32
    %0 = arith.cmpi eq, %arg1, %c0_i32 : i32
    %1 = arith.extui %0 : i1 to i32
    %c0_i32_0 = arith.constant 0 : i32
    %2 = arith.cmpi ne, %1, %c0_i32_0 : i32
    scf.if %2 {
      %cst_10 = arith.constant 0.000000e+00 : f32
      %12 = vector.broadcast %cst_10 : f32 to vector<64x128xf32>
      %c0_11 = arith.constant 0 : index
      %c0_12 = arith.constant 0 : index
      %13 = vector.load %arg6[%c0_11, %c0_12] : memref<64x128xf32, #tpu.memory_space<vmem>>, vector<64x128xf32>
      tpu.vector_store %arg6[%c0_11, %c0_12], %12 {strides = array<i32>} : memref<64x128xf32, #tpu.memory_space<vmem>>, vector<64x128xf32>,
    } else {
    }
    %c0 = arith.constant 0 : index
    %c0_1 = arith.constant 0 : index
    %3 = vector.load %arg6[%c0, %c0_1] : memref<64x128xf32, #tpu.memory_space<vmem>>, vector<64x128xf32>
    %c0_2 = arith.constant 0 : index
    %c0_3 = arith.constant 0 : index
    %4 = vector.load %arg2[%c0_2, %c0_3] : memref<64x32xf32, #tpu.memory_space<vmem>>, vector<64x32xf32>
    %c0_4 = arith.constant 0 : index
    %c0_5 = arith.constant 0 : index
    %5 = vector.load %arg3[%c0_4, %c0_5] : memref<32x128xf32, #tpu.memory_space<vmem>>, vector<32x128xf32>
    %cst = arith.constant dense<0.000000e+00> : vector<64x128xf32>
    %6 = tpu.matmul %4, %5, %cst {dimension_numbers = #tpu.dot_dimension_numbers<[1], [0], [0], [1], [0, 0, 1, 1], [], []>} : vector<64x32xf32>, vector<32x128xf32>, vector<64x128xf32> -> vector<64x128xf32>
    %7 = arith.addf %3, %6 : vector<64x128xf32>
    %c0_6 = arith.constant 0 : index
    %c0_7 = arith.constant 0 : index
    %8 = vector.load %arg6[%c0_6, %c0_7] : memref<64x128xf32, #tpu.memory_space<vmem>>, vector<64x128xf32>
    tpu.vector_store %arg6[%c0_6, %c0_7], %7 {strides = array<i32>} : memref<64x128xf32, #tpu.memory_space<vmem>>, vector<64x128xf32>,
    %c0_i32_8 = arith.constant 0 : i32
    %9 = arith.cmpi eq, %arg1, %c0_i32_8 : i32
    %10 = arith.extui %9 : i1 to i32
    %c0_i32_9 = arith.constant 0 : i32
    %11 = arith.cmpi ne, %10, %c0_i32_9 : i32
    scf.if %11 {
      %c0_10 = arith.constant 0 : index
      %c0_11 = arith.constant 0 : index
      %12 = vector.load %arg6[%c0_10, %c0_11] : memref<64x128xf32, #tpu.memory_space<vmem>>, vector<64x128xf32>
      %13 = vector.shape_cast %12 : vector<64x128xf32> to vector<4x16x128xf32>
      %c0_12 = arith.constant 0 : index
      %c0_13 = arith.constant 0 : index
      %14 = vector.load %arg4[%c0_12, %c0_13] : memref<16x128xf32, #tpu.memory_space<vmem>>, vector<16x128xf32>
      %15 = vector.shape_cast %14 : vector<16x128xf32> to vector<1x16x128xf32>
      %16 = vector.broadcast %15 : vector<1x16x128xf32> to vector<4x16x128xf32>
      %17 = arith.addf %13, %16 : vector<4x16x128xf32>
      %cst_14 = arith.constant 0.000000e+00 : f32
      %18 = vector.broadcast %cst_14 : f32 to vector<4x16x128xf32>
      %19 = arith.maximumf %17, %18 : vector<4x16x128xf32>
      %cst_15 = arith.constant dense<0.000000e+00> : vector<4x128xf32>
      %20 = vector.multi_reduction <add>, %19, %cst_15 [1] : vector<4x16x128xf32> to vector<4x128xf32>
      %cst_16 = arith.constant 6.250000e-02 : f32
      %21 = vector.broadcast %cst_16 : f32 to vector<4x128xf32>
      %22 = arith.mulf %20, %21 : vector<4x128xf32>
      %c0_17 = arith.constant 0 : index
      %c0_18 = arith.constant 0 : index
      %23 = vector.load %arg5[%c0_17, %c0_18] : memref<4x128xf32, #tpu.memory_space<vmem>>, vector<4x128xf32>
      tpu.vector_store %arg5[%c0_17, %c0_18], %22 {strides = array<i32>} : memref<4x128xf32, #tpu.memory_space<vmem>>, vector<4x128xf32>,
    } else {
    }
    return
  }
  func.func @transform_0(%arg0: i32, %arg1: i32) -> (i32, i32) {
    %c0_i32 = arith.constant 0 : i32
    return %arg0, %arg1 : i32, i32
  }
  func.func @transform_1(%arg0: i32, %arg1: i32) -> (i32, i32) {
    %c0_i32 = arith.constant 0 : i32
    %c0_i32_0 = arith.constant 0 : i32
    %c0_i32_1 = arith.constant 0 : i32
    return %c0_i32, %c0_i32_0 : i32, i32
  }
  func.func @transform_2(%arg0: i32, %arg1: i32) -> (i32, i32) {
    %c0_i32 = arith.constant 0 : i32
    %c0_i32_0 = arith.constant 0 : i32
    %c0_i32_1 = arith.constant 0 : i32
    return %c0_i32, %c0_i32_0 : i32, i32
  }
  func.func @transform_3(%arg0: i32, %arg1: i32) -> (i32, i32) {
    %c0_i32 = arith.constant 0 : i32
    %c0_i32_0 = arith.constant 0 : i32
    return %arg0, %c0_i32 : i32, i32
  }
}

</mosaic_0001>

<bundles_post_ra>
// kernel: tpu_custom_call.1
= control target key start
LH: loop header
LB: loop body
LE: loop exit
PB: predicated region body
PF: predicated region fallthrough
CT: control target
= control target key end

     0   :  { %vm47_vm0 = vcmask 261120   ;;  %s440_s0 = inlined_call_operand.vmem [shape: f32[64,32], index: 0, kind: input, shape index: {}]   ;;  %s441_s1 = inlined_call_operand.vmem [shape: f32[32,128], index: 1, kind: input, shape index: {}]   ;;  %s442_s2 = inlined_call_operand.vmem [shape: f32[16,128], index: 2, kind: input, shape index: {}]   ;;  %s443_s3 = inlined_call_operand.hbm [shape: f32[4,128], index: 3, kind: output, shape index: {}]  }
   0x1   :  { %v43_v0 = vld [vmem:[%s441_s1] sm:$0xff]  ;;  %v44_v1 = vld [vmem:[%s441_s1 + $0x8] sm:$0xff]  ;;  %v45_v2 = vld [vmem:[%s441_s1 + $0x10] sm:$0xff] }
   0x2   :  { %v320_v3 = vpack.c.bf16 %v44_v1, %v43_v0  ;;  %v46_v4 = vld [vmem:[%s441_s1 + $0x18] sm:$0xff]  ;;  %v35_v5 = vld [vmem:[%s440_s0] sm:$0xff] }
   0x3   :  { %v39_v6 = vld [vmem:[%s440_s0 + $0x20] sm:$0xff]  ;;  %v324_v7 = vpack.c.bf16 %v46_v4, %v45_v2  ;;  %308 = vmatprep.mubr.msk.f32.mxu0 %vm47_vm0, %v35_v5 }
   0x4   :  { %314 = vmatprep.mubr.msk.f32.mxu1 %vm47_vm0, %v39_v6  ;;  %321 = vmatprep.subr.bf16.mxu0 %v320_v3 }
   0x5   :  { %328 = vmatprep.subr.bf16.mxu1 %v320_v3  ;;  %323 = vmatpush3.bf16.msra.mxu0 %v320_v3 }
   0x6   :  { %330 = vmatpush3.bf16.msra.mxu1 %v320_v3 }
   0x7   :  { %8 = vsyncpa [#allocation4], 0  ;;  %325 = vmatprep.subr.bf16.mxu0 %v324_v7  ;;  %329 = vmatprep.subr.bf16.mxu1 %v324_v7  ;;  %v36_v8 = vld [vmem:[%s440_s0 + $0x8] sm:$0xff]  ;;  %v37_v10 = vld [vmem:[%s440_s0 + $0x10] sm:$0xff]  ;;  %vm258_vm1 = vcmask 1041409   ;;  %vm260_vm2 = vcmask 1042434  }
   0x8   :  { %v40_v9 = vld [vmem:[%s440_s0 + $0x28] sm:$0xff]  ;;  %v41_v11 = vld [vmem:[%s440_s0 + $0x30] sm:$0xff]  ;;  %v38_v12 = vld [vmem:[%s440_s0 + $0x18] sm:$0xff]  ;;  %vm262_vm3 = vcmask 1043459  }
   0x9   :  { %327 = vmatpush3.bf16.msra.mxu0 %v324_v7  ;;  %v42_v13 = vld [vmem:[%s440_s0 + $0x38] sm:$0xff]  ;;  %v205_v14 = vld [vmem:[%s442_s2 + $0x8] sm:$0xff]  ;;  %v204_v15 = vld [vmem:[%s442_s2] sm:$0xff]  ;;  %s357_s0 = smov [#allocation3]  }
   0xa   :  { %331 = vmatpush3.bf16.msra.mxu1 %v324_v7  ;;  %s272_s2 = sshll.u32 %s357_s0, 4  ;;  %s273_s2 = int_to_ptr.vmem [resolvable:$true] %s272_s2 }
   0xb   :  { %s333_s12 = scalar_lea.vmem %s273_s2, 64  ;;  %p338_p1 = scmp.lt.s32.totalorder %s273_s2, %s273_s2 }
   0xc   :  { %309 = vmatmul.mubr.msk.f32.vlgmr.msra.gmra.mrb[0].mxu0 %vm47_vm0, %v36_v8  ;;  %p334_p0 = scmp.ne.s32.totalorder %s273_s2, %s333_s12  ;;  %p339_p2 = scmp.lt.s32.totalorder %s333_s12, %s333_s12 }
   0xd   :  { %315 = vmatmul.mubr.msk.f32.vlgmr.msra.gmra.mrb[0].mxu1 %vm47_vm0, %v40_v9  ;;  %311 = vmatprep.mubr.msk.f32.mxu0 %vm47_vm0, %v37_v10 }
   0xe   :  { %317 = vmatprep.mubr.msk.f32.mxu1 %vm47_vm0, %v41_v11  ;;  %p340_p3 = por %p339_p2, %p338_p1 }
  0x10   :  { %312 = vmatmul.mubr.msk.f32.gmra.mrb[2].mxu0 %vm47_vm0, %v38_v12  ;;  %p341_p4 = pnand %p340_p3, %p334_p0 }
  0x11   :  { %318 = vmatmul.mubr.msk.f32.gmra.mrb[2].mxu1 %vm47_vm0, %v42_v13 }
  0xdf   :  { %v310_v16 = vpop.f32.mrb[0].mxu0 }
  0xe0   :  { %v316_v17 = vpop.f32.mrb[0].mxu1  ;;  %v207_v18 = vadd.f32 %v310_v16, %v205_v14  ;;  %v138_v20 = vpop.f32.mrb[1].mxu0 }
  0xe1   :  { %v211_v19 = vadd.f32 %v316_v17, %v205_v14  ;;  %v158_v21 = vpop.f32.mrb[1].mxu1  ;;  %v206_v22 = vadd.f32 %v204_v15, %v138_v20 }
  0xe2   :  { %v210_v23 = vadd.f32 %v204_v15, %v158_v21  ;;  %v215_v24 = vmax.f32 %v207_v18, 0.0 }
  0xe3   :  { %v219_v25 = vmax.f32 %v211_v19, 0.0  ;;  %v214_v26 = vmax.f32 %v206_v22, 0.0  ;;  %v313_v28 = vpop.f32.mrb[2].mxu0 }
  0xe4   :  { %v218_v27 = vmax.f32 %v210_v23, 0.0  ;;  %v319_v29 = vpop.f32.mrb[2].mxu1  ;;  %v209_v30 = vadd.f32 %v313_v28, %v205_v14  ;;  %v148_v32 = vpop.f32.mrb[3].mxu0 }
  0xe5   :  { %v213_v31 = vadd.f32 %v319_v29, %v205_v14  ;;  %v168_v33 = vpop.f32.mrb[3].mxu1  ;;  %v222_v34 = vadd.f32 %v215_v24, %v214_v26  ;;  %v208_v36 = vadd.f32 %v204_v15, %v148_v32 }
  0xe6   :  { %v236_v35 = vadd.f32 %v219_v25, %v218_v27  ;;  %v212_v37 = vadd.f32 %v204_v15, %v168_v33  ;;  %v217_v38 = vmax.f32 %v209_v30, 0.0 }
  0xe7   :  { %v221_v39 = vmax.f32 %v213_v31, 0.0  ;;  %v223_v40 = vrot.slane %v222_v34, 4  ;;  %v216_v42 = vmax.f32 %v208_v36, 0.0 }
  0xe8   :  { %v237_v41 = vrot.slane %v236_v35, 4  ;;  %v220_v43 = vmax.f32 %v212_v37, 0.0 }
  0xe9   :  { %v224_v44 = vadd.f32 %v223_v40, %v222_v34  ;;  %v229_v46 = vadd.f32 %v217_v38, %v216_v42 }
  0xea   :  { %v238_v45 = vadd.f32 %v237_v41, %v236_v35  ;;  %v243_v47 = vadd.f32 %v221_v39, %v220_v43 }
  0xeb   :  { %v225_v48 = vrot.slane %v224_v44, 2  ;;  %v230_v50 = vrot.slane %v229_v46, 4 }
  0xec   :  { %v239_v49 = vrot.slane %v238_v45, 2  ;;  %v244_v51 = vrot.slane %v243_v47, 4 }
  0xed   :  { %v226_v52 = vadd.f32 %v225_v48, %v224_v44  ;;  %v231_v54 = vadd.f32 %v230_v50, %v229_v46 }
  0xee   :  { %v240_v53 = vadd.f32 %v239_v49, %v238_v45  ;;  %v245_v55 = vadd.f32 %v244_v51, %v243_v47 }
  0xef   :  { %v227_v56 = vrot.slane %v226_v52, 1  ;;  %v232_v57 = vrot.slane %v231_v54, 2 }
  0xf0   :  { %v246_v58 = vrot.slane %v245_v55, 2  ;;  %v241_v59 = vrot.slane %v240_v53, 1 }
  0xf1   :  { %v233_v60 = vadd.f32 %v232_v57, %v231_v54  ;;  %v228_v62 = vadd.f32 %v227_v56, %v226_v52 }
  0xf2   :  { %v247_v61 = vadd.f32 %v246_v58, %v245_v55  ;;  %v242_v1 = vadd.f32 %v241_v59, %v240_v53 }
  0xf3   :  { %v234_v63 = vrot.slane %v233_v60, 1  ;;  %v250_v4 = vmul.f32 0.0625, %v228_v62 }
  0xf4   :  { %v248_v0 = vrot.slane %v247_v61, 1  ;;  %v252_v6 = vmul.f32 0.0625, %v242_v1 }
  0xf5   :  { %v235_v2 = vadd.f32 %v234_v63, %v233_v60 }
  0xf6   :  { %v249_v3 = vadd.f32 %v248_v0, %v247_v61 }
  0xf7   :  { %v251_v5 = vmul.f32 0.0625, %v235_v2 }
  0xf8   :  { %v253_v7 = vmul.f32 0.0625, %v249_v3 }
  0xf9   :  { %v259_v8 = vsel %vm258_vm1, %v251_v5, %v250_v4 }
  0xfa   :  { %v261_v9 = vsel %vm260_vm2, %v252_v6, %v259_v8 }
  0xfb   :  { %v263_v10 = vsel %vm262_vm3, %v253_v7, %v261_v9 }
  0xfc   :  { %265 = vst [vmem:[#allocation3] sm:$0xf] %v263_v10 }
  0xfd   :  { %344 = shalt.err (!%p341_p4)
}
  0xfe   :  { %s345_s15 = scalar_lea.hbm %s443_s3, 64 }
  0xff   :  { %p346_p5 = scmp.ne.s32.totalorder %s443_s3, %s345_s15  ;;  %p349_p6 = scmp.lt.u32.totalorder %s345_s15, %s443_s3 }
 0x101   :  { %p351_p7 = pnand %p349_p6, %p346_p5 }
 0x103   :  { %354 = shalt.err (!%p351_p7)
}
 0x104   :  { %275 = dma.vmem_to_hbm [thread:$0]  %s273_s2, 64, %s443_s3, [#allocation4]  }
 0x105   :  { %355 = dma.done.wait [#allocation4], 64  }
 0x106   :  { %356 = vsyncadd [#allocation4], 4294967232 }
 0x107   :  { %279 = vsyncpa [#allocation4], 1 }

</bundles_post_ra>
